<compile_context>
chip_gen: v7x
topology: tpu7x:2x2x1
jax: 0.10.0
libtpu: 0.0.40
codegen_flags: <defaults>
</compile_context>

<pallas_src>
import functools

import jax
import jax.numpy as jnp
from jax.experimental import pallas as pl
from jax.experimental.pallas import tpu as pltpu


def _round_up(x, m):
    return (x + m - 1) // m * m


def _causal_conv1d_kernel(x_ref, w_ref, b_ref, o_ref, halo_ref, *,
                          K, dilation, pad, compute_dtype, fuse_taps):
    """One (batch, time-tile) grid step.

    x_ref   : (1, C_in, tT)            input tile, original dtype (cast in-kernel)
    w_ref   : (C_out, K * C_in)        compute dtype, column order [k, c_in]
    b_ref   : (C_out, 1)               float32
    o_ref   : (1, C_out, tT)           output dtype (partial last tile masked)
    halo_ref: (C_in, round_up(pad,128)) compute dtype; carries the last input
              columns across the sequential time axis (zeroed at t == 0).
    """
    t = pl.program_id(1)
    C_in = x_ref.shape[1]
    tT = o_ref.shape[2]

    xt = x_ref[0].astype(compute_dtype)                          # (C_in, tT)

    if pad > 0:
        pad_r = halo_ref.shape[1]                                # lane-aligned halo

        @pl.when(t == 0)
        def _zero_halo():                                        # causal left zeros
            halo_ref[...] = jnp.zeros_like(halo_ref)

        xw = jnp.concatenate([halo_ref[...], xt], axis=1)        # (C_in, pad_r + tT)
        halo_ref[...] = xw[:, tT:]                               # carry last cols
        off0 = pad_r - pad                                       # first-tap offset
    else:
        xw = xt
        off0 = 0

    w = w_ref[...]                                               # (C_out, K*C_in)
    if fuse_taps:
        # Single MXU matmul: taps stacked along the (sublane-aligned) contraction.
        xs = jnp.concatenate(
            [xw[:, off0 + k * dilation: off0 + k * dilation + tT]
             for k in range(K)], axis=0)                         # (K*C_in, tT)
        acc = jnp.dot(w, xs, preferred_element_type=jnp.float32)
    else:
        # K accumulated dots: no stacked-tap materialization (fewer vector stores,
        # bounded VMEM for large K*C_in); contraction depth == C_in per pass.
        acc = jnp.dot(w[:, :C_in], xw[:, off0: off0 + tT],
                      preferred_element_type=jnp.float32)
        for k in range(1, K):
            acc = acc + jnp.dot(
                w[:, k * C_in:(k + 1) * C_in],
                xw[:, off0 + k * dilation: off0 + k * dilation + tT],
                preferred_element_type=jnp.float32)

    o_ref[0] = (acc + b_ref[...]).astype(o_ref.dtype)            # f32 bias add


def causal_conv1d(x, weight, bias, *, dilation=1, time_tile=None,
                  compute_dtype=jnp.bfloat16, out_dtype=None):
    """Causal conv1d == torch Conv1d(padding=(K-1)*d)(x)[..., :-pad].

    x: (N, C_in, T); weight: (C_out, C_in, K); bias: (C_out,).
    Returns (N, C_out, T) in `out_dtype` (default: x.dtype).
    NOTE: K == 1 (pad == 0) is treated as the identity-length causal conv
    (torch's `x[..., :-0]` would return an empty tensor).
    """
    N, C_in, T = x.shape
    C_out, _, K = weight.shape
    pad = (K - 1) * dilation
    out_dtype = x.dtype if out_dtype is None else out_dtype

    c_item = jnp.dtype(compute_dtype).itemsize
    x_item = jnp.dtype(x.dtype).itemsize
    o_item = jnp.dtype(out_dtype).itemsize
    pack = (8 * 4) // c_item                       # sublane packing (16 bf16 / 8 f32)

    # Fuse taps into one contraction only while it is sublane-aligned and within
    # MXU depth; otherwise accumulate per-tap dots (no stacked-tap copy).
    fuse_taps = (K > 1) and (C_in % pack == 0) and (K * C_in <= 256)

    # --- lane-dense, VMEM-aware time tile (fits v7x's 64 MiB with headroom) ---
    T128 = _round_up(T, 128)
    per_col = (2 * C_in * x_item                   # double-buffered input block
               + 2 * C_out * o_item                # double-buffered output block
               + 2 * C_in * c_item                 # in-kernel cast + halo'd window
               + C_out * 4)                        # f32 accumulator
    if fuse_taps:
        per_col += K * C_in * c_item               # stacked-tap copy
    if time_tile is None:
        budget = 20 * 1024 * 1024
        tT = max(128, min(8192, (budget // per_col) // 128 * 128))
    else:
        tT = _round_up(time_tile, 128)
    tT = min(tT, T128)
    nT = pl.cdiv(T, tT)

    # Tiny one-time weight/bias re-layout (column index = k*C_in + c).
    w2 = weight.transpose(0, 2, 1).reshape(C_out, K * C_in).astype(compute_dtype)
    b2 = bias.reshape(C_out, 1).astype(jnp.float32)

    halo_cols = _round_up(max(pad, 1), 128)        # lane-aligned carry buffer

    kernel = functools.partial(
        _causal_conv1d_kernel, K=K, dilation=dilation, pad=pad,
        compute_dtype=compute_dtype, fuse_taps=fuse_taps)

    return pl.pallas_call(
        kernel,
        out_shape=jax.ShapeDtypeStruct((N, C_out, T), out_dtype),
        grid_spec=pltpu.PrefetchScalarGridSpec(
            num_scalar_prefetch=0,
            grid=(N, nT),                          # batch outer, time inner (carry)
            in_specs=[
                pl.BlockSpec((1, C_in, tT), lambda n, t: (n, 0, t)),
                pl.BlockSpec((C_out, K * C_in), lambda n, t: (0, 0)),
                pl.BlockSpec((C_out, 1), lambda n, t: (0, 0)),
            ],
            out_specs=pl.BlockSpec((1, C_out, tT), lambda n, t: (n, 0, t)),
            scratch_shapes=[pltpu.VMEM((C_in, halo_cols), compute_dtype)],
        ),
        compiler_params=pltpu.CompilerParams(
            # Time axis carries the halo scratch -> sequential ("arbitrary");
            # batch axis stays "parallel" for megacore sharding.
            dimension_semantics=("parallel", "arbitrary"),
            vmem_limit_bytes=64 * 1024 * 1024,
        ),
    )(x, w2, b2)


def _reference_causal_conv1d(x, weight, bias, *, dilation=1):
    """Pure-JAX reference matching torch Conv1d(pad=(K-1)*d)(x)[..., :-pad]."""
    N, C_in, T = x.shape
    C_out, _, K = weight.shape
    pad = (K - 1) * dilation
    xp = jnp.pad(x, ((0, 0), (0, 0), (pad, 0)))
    out = jnp.zeros((N, C_out, T), jnp.float32)
    for k in range(K):
        xk = xp[:, :, k * dilation: k * dilation + T]            # (N, C_in, T)
        out = out + jnp.einsum("oc,nct->not", weight[:, :, k], xk)
    return out + bias[None, :, None]


if __name__ == "__main__":
    # Small shapes consistent with the module's forward.
    N, C_in, C_out, T = 2, 4, 6, 16
    K, dilation = 3, 2          # pad = (K-1)*dilation = 4

    key = jax.random.PRNGKey(0)
    kx, kw, kb = jax.random.split(key, 3)

    x = jax.random.normal(kx, (N, C_in, T), dtype=jnp.float32)

    # Deterministic PyTorch-style uniform(-1/sqrt(fan_in*K), +) init.
    bound = 1.0 / (C_in * K) ** 0.5
    weight = jax.random.uniform(kw, (C_out, C_in, K), jnp.float32, -bound, bound)
    bias = jax.random.uniform(kb, (C_out,), jnp.float32, -bound, bound)

    out = causal_conv1d(x, weight, bias, dilation=dilation)
    out = jax.block_until_ready(out)

    # MXU gets bf16 operands with f32 accumulation, so compare against a
    # reference computed on bf16-rounded operands (tight tolerance).
    x_r = x.astype(jnp.bfloat16).astype(jnp.float32)
    w_r = weight.astype(jnp.bfloat16).astype(jnp.float32)
    ref = _reference_causal_conv1d(x_r, w_r, bias, dilation=dilation)

    assert out.shape == (N, C_out, T)
    assert jnp.allclose(out, ref, atol=1e-4, rtol=1e-4), float(
        jnp.max(jnp.abs(out - ref)))

    print("KERNEL_OK")
</pallas_src>

<mosaic_0001>
module attributes {stable_mosaic.version = 11 : i64} {
  func.func @_causal_conv1d_kernel(%arg0: i32, %arg1: i32, %arg2: memref<1x4x128xf32, #tpu.memory_space<vmem>>, %arg3: memref<6x12xbf16, #tpu.memory_space<vmem>>, %arg4: memref<6x1xf32, #tpu.memory_space<vmem>>, %arg5: memref<1x6x128xf32, #tpu.memory_space<vmem>>, %arg6: memref<4x128xbf16, #tpu.memory_space<vmem>>) attributes {dimension_semantics = [#tpu.dimension_semantics<parallel>, #tpu.dimension_semantics<arbitrary>], iteration_bounds = array<i64: 2, 1>, scalar_prefetch = 0 : i64, scratch_operands = 1 : i64, tpu.core_type = #tpu.core_type<tc>, window_params = [{transform_indices = @transform_0, window_bounds = array<i64: 1, 4, 128>}, {pipeline_mode = #tpu.pipeline_mode<synchronous>, transform_indices = @transform_1, window_bounds = array<i64: 6, 12>}, {pipeline_mode = #tpu.pipeline_mode<synchronous>, transform_indices = @transform_2, window_bounds = array<i64: 6, 1>}, {transform_indices = @transform_3, window_bounds = array<i64: 1, 6, 128>}]} {
    %c0 = arith.constant 0 : index
    %c0_0 = arith.constant 0 : index
    %c0_1 = arith.constant 0 : index
    %0 = vector.load %arg2[%c0, %c0_0, %c0_1] : memref<1x4x128xf32, #tpu.memory_space<vmem>>, vector<1x4x128xf32>
    %1 = vector.shape_cast %0 : vector<1x4x128xf32> to vector<4x128xf32>
    %2 = arith.truncf %1 : vector<4x128xf32> to vector<4x128xbf16>
    %c0_i32 = arith.constant 0 : i32
    %3 = arith.cmpi eq, %arg1, %c0_i32 : i32
    %4 = arith.extui %3 : i1 to i32
    %c0_i32_2 = arith.constant 0 : i32
    %5 = arith.cmpi ne, %4, %c0_i32_2 : i32
    scf.if %5 {
      %cst_16 = arith.constant 0.000000e+00 : bf16
      %28 = vector.broadcast %cst_16 : bf16 to vector<4x128xbf16>
      %c0_17 = arith.constant 0 : index
      %c0_18 = arith.constant 0 : index
      %29 = vector.load %arg6[%c0_17, %c0_18] : memref<4x128xbf16, #tpu.memory_space<vmem>>, vector<4x128xbf16>
      tpu.vector_store %arg6[%c0_17, %c0_18], %28 {strides = array<i32>} : memref<4x128xbf16, #tpu.memory_space<vmem>>, vector<4x128xbf16>,
    } else {
    }
    %c0_3 = arith.constant 0 : index
    %c0_4 = arith.constant 0 : index
    %6 = vector.load %arg6[%c0_3, %c0_4] : memref<4x128xbf16, #tpu.memory_space<vmem>>, vector<4x128xbf16>
    %7 = tpu.concatenate %6, %2 in 1 : vector<4x128xbf16>, vector<4x128xbf16> -> vector<4x256xbf16>
    %8 = vector.extract_strided_slice %7 {offsets = [0, 128], sizes = [4, 128], strides = [1, 1]} : vector<4x256xbf16> to vector<4x128xbf16>
    %c0_5 = arith.constant 0 : index
    %c0_6 = arith.constant 0 : index
    %9 = vector.load %arg6[%c0_5, %c0_6] : memref<4x128xbf16, #tpu.memory_space<vmem>>, vector<4x128xbf16>
    tpu.vector_store %arg6[%c0_5, %c0_6], %8 {strides = array<i32>} : memref<4x128xbf16, #tpu.memory_space<vmem>>, vector<4x128xbf16>,
    %c0_7 = arith.constant 0 : index
    %c0_8 = arith.constant 0 : index
    %10 = vector.load %arg3[%c0_7, %c0_8] : memref<6x12xbf16, #tpu.memory_space<vmem>>, vector<6x12xbf16>
    %11 = vector.extract_strided_slice %10 {offsets = [0, 0], sizes = [6, 4], strides = [1, 1]} : vector<6x12xbf16> to vector<6x4xbf16>
    %12 = vector.extract_strided_slice %7 {offsets = [0, 124], sizes = [4, 128], strides = [1, 1]} : vector<4x256xbf16> to vector<4x128xbf16>
    %cst = arith.constant dense<0.000000e+00> : vector<6x128xf32>
    %13 = tpu.matmul %11, %12, %cst {dimension_numbers = #tpu.dot_dimension_numbers<[1], [0], [0], [1], [0, 0, 1, 1], [], []>} : vector<6x4xbf16>, vector<4x128xbf16>, vector<6x128xf32> -> vector<6x128xf32>
    %14 = vector.extract_strided_slice %10 {offsets = [0, 4], sizes = [6, 4], strides = [1, 1]} : vector<6x12xbf16> to vector<6x4xbf16>
    %15 = vector.extract_strided_slice %7 {offsets = [0, 126], sizes = [4, 128], strides = [1, 1]} : vector<4x256xbf16> to vector<4x128xbf16>
    %cst_9 = arith.constant dense<0.000000e+00> : vector<6x128xf32>
    %16 = tpu.matmul %14, %15, %cst_9 {dimension_numbers = #tpu.dot_dimension_numbers<[1], [0], [0], [1], [0, 0, 1, 1], [], []>} : vector<6x4xbf16>, vector<4x128xbf16>, vector<6x128xf32> -> vector<6x128xf32>
    %17 = arith.addf %13, %16 : vector<6x128xf32>
    %18 = vector.extract_strided_slice %10 {offsets = [0, 8], sizes = [6, 4], strides = [1, 1]} : vector<6x12xbf16> to vector<6x4xbf16>
    %19 = vector.extract_strided_slice %7 {offsets = [0, 128], sizes = [4, 128], strides = [1, 1]} : vector<4x256xbf16> to vector<4x128xbf16>
    %cst_10 = arith.constant dense<0.000000e+00> : vector<6x128xf32>
    %20 = tpu.matmul %18, %19, %cst_10 {dimension_numbers = #tpu.dot_dimension_numbers<[1], [0], [0], [1], [0, 0, 1, 1], [], []>} : vector<6x4xbf16>, vector<4x128xbf16>, vector<6x128xf32> -> vector<6x128xf32>
    %21 = arith.addf %17, %20 : vector<6x128xf32>
    %c0_11 = arith.constant 0 : index
    %c0_12 = arith.constant 0 : index
    %22 = vector.load %arg4[%c0_11, %c0_12] : memref<6x1xf32, #tpu.memory_space<vmem>>, vector<6x1xf32>
    %23 = vector.broadcast %22 : vector<6x1xf32> to vector<6x128xf32>
    %24 = arith.addf %21, %23 : vector<6x128xf32>
    %c0_13 = arith.constant 0 : index
    %c0_14 = arith.constant 0 : index
    %c0_15 = arith.constant 0 : index
    %25 = vector.load %arg5[%c0_13, %c0_14, %c0_15] : memref<1x6x128xf32, #tpu.memory_space<vmem>>, vector<1x6x128xf32>
    %26 = vector.shape_cast %25 : vector<1x6x128xf32> to vector<6x128xf32>
    %27 = vector.shape_cast %24 : vector<6x128xf32> to vector<1x6x128xf32>
    tpu.vector_store %arg5[%c0_13, %c0_14, %c0_15], %27 {strides = array<i32>} : memref<1x6x128xf32, #tpu.memory_space<vmem>>, vector<1x6x128xf32>,
    return
  }
  func.func @transform_0(%arg0: i32, %arg1: i32) -> (i32, i32, i32) {
    %c0_i32 = arith.constant 0 : i32
    %c0_i32_0 = arith.constant 0 : i32
    return %arg0, %c0_i32, %arg1 : i32, i32, i32
  }
  func.func @transform_1(%arg0: i32, %arg1: i32) -> (i32, i32) {
    %c0_i32 = arith.constant 0 : i32
    %c0_i32_0 = arith.constant 0 : i32
    %c0_i32_1 = arith.constant 0 : i32
    return %c0_i32, %c0_i32_0 : i32, i32
  }
  func.func @transform_2(%arg0: i32, %arg1: i32) -> (i32, i32) {
    %c0_i32 = arith.constant 0 : i32
    %c0_i32_0 = arith.constant 0 : i32
    %c0_i32_1 = arith.constant 0 : i32
    return %c0_i32, %c0_i32_0 : i32, i32
  }
  func.func @transform_3(%arg0: i32, %arg1: i32) -> (i32, i32, i32) {
    %c0_i32 = arith.constant 0 : i32
    %c0_i32_0 = arith.constant 0 : i32
    return %arg0, %c0_i32, %arg1 : i32, i32, i32
  }
}

</mosaic_0001>

<bundles_post_ra>
// kernel: tpu_custom_call.1
= control target key start
LH: loop header
LB: loop body
LE: loop exit
PB: predicated region body
PF: predicated region fallthrough
CT: control target
= control target key end

     0   :  { %8 = vsyncpa [#allocation4], 0  ;;  %s1112_s0 = inlined_call_operand.hbm [shape: f32[2,4,16], index: 0, kind: input, shape index: {}]   ;;  %s1113_s1 = inlined_call_operand.hbm [shape: bf16[6,12], index: 1, kind: input, shape index: {}]   ;;  %s1114_s2 = inlined_call_operand.hbm [shape: f32[6,1], index: 2, kind: input, shape index: {}]   ;;  %s1115_s3 = inlined_call_operand.hbm [shape: f32[2,6,16], index: 3, kind: output, shape index: {}]  }
   0x1   :  { %10 = vsyncpa [#allocation4 + $0x1], 0 }
   0x2   :  { %11 = vsyncpa [#allocation7], 0 }
   0x3   :  { %12 = vsyncpa [#allocation5], 0 }
   0x4   :  { %14 = vsyncpa [#allocation5 + $0x1], 0  ;;  %s865_s12 = smov 0   ;;  %s867_s13 = smov 0  }
   0x5   :  { %s869_s14 = smov 0   ;;  %s871_s15 = smov 0  }
   0x6   :  { %s873_s16 = smov 0   ;;  %s875_s17 = smov 0  }
   0x7 LB: > { %s523_s18 = sadd.s32 4294967295, %s832_s17   ;;  %s524_s19 = sadd.s32 4294967294, %s832_s17   ;;  %s832_s17 = sphi %s875_s17, %s20_s17   ;;  %s828_s16 = sphi %s873_s16, %s1138_s16   ;;  %s824_s15 = sphi %s871_s15, %s1137_s15   ;;  %s820_s14 = sphi %s869_s14, %s1136_s14   ;;  %s816_s13 = sphi %s867_s13, %s1135_s13   ;;  %s812_s12 = sphi %s865_s12, %s1134_s12  }
   0x8   : > { %p54_p0 = scmp.ne.s32.totalorder %s816_s13, %s812_s12  ;;  %p899_p1 = scmp.eq.s32.totalorder %s523_s18, 0 }
   0x9   : > { %p903_p2 = scmp.eq.s32.totalorder %s523_s18, 1  ;;  %p128_p3 = scmp.eq.s32.totalorder %s524_s19, 1 }
   0xa   : > { %s1120_s20 = scalar_select %p899_p1, 1, 0 }
   0xb   : > { %s1121_s21 = scalar_select %p903_p2, 1, 0 }
   0xc   : > { %p909_p4 = por %p899_p1, %p54_p0  ;;  %p525_p5 = scmp.ge.s32.totalorder %s832_s17, 1 }
   0xd   : > { %p914_p6 = por %p128_p3, %p54_p0  ;;  %p135_p7 = scmp.lt.s32.totalorder %s832_s17, 3 }
   0xe   : > { %s1122_s22 = scalar_select %p909_p4, 1, 0 }
   0xf   : > { %s1123_s23 = scalar_select %p914_p6, 1, 0 }
  0x10   : > { %p919_p8 = pnand %p525_p5, %p135_p7  ;;  %s834_s25 = smov [#allocation6]  }
  0x11   : > { %s148_s26 = sshll.u32 %s834_s25, 4  ;;  %s835_s27 = smov [#allocation8]   ;;  %s149_s26 = int_to_ptr.vmem [resolvable:$true] %s148_s26 }
  0x12   : > { %s1124_s24 = scalar_select %p919_p8, 1, 0 }
  0x13   : > { %p580_p10 = pneg %p919_p8  ;;  %s159_s28 = sshll.u32 %s835_s27, 4  ;;  %s932_s28 = int_to_ptr.vmem [resolvable:$true] %s159_s28 }
  0x14   : > { %s660_s5 = scalar_lea.hbm %s1113_s1, 64 }
  0x15   : > { %p928_p11 = pnand %p580_p10, %p899_p1  ;;  %p661_p12 = scmp.ne.s32.totalorder %s1113_s1, %s660_s5 }
  0x16   : > { %p667_p5 = scmp.lt.u32.totalorder %s660_s5, %s1113_s1 }
  0x17   : > { %p662_p13 = pneg %p928_p11 }
  0x19   : > { %p663_p0 = pnand %p662_p13, %p661_p12 }
  0x1b   : > { %p664_p3 = pneg %p663_p0 }
  0x1d   : > { %p669_p7 = pnand %p667_p5, %p664_p3 }
  0x1f   : > { %672 = shalt.err (!%p669_p7)
}
  0x20   : > { %s673_s10 = scalar_lea.vmem %s149_s26, 64  ;;  %p681_p1 = scmp.lt.s32.totalorder %s149_s26, %s149_s26 }
  0x21   : > { %p674_p10 = scmp.ne.s32.totalorder %s149_s26, %s673_s10  ;;  %p682_p4 = scmp.lt.s32.totalorder %s673_s10, %s673_s10 }
  0x23   : > { %p676_p9 = pnand %p674_p10, %p662_p13  ;;  %p683_p8 = por %p682_p4, %p681_p1 }
  0x25   : > { %p677_p6 = pneg %p676_p9 }
  0x27   : > { %p684_p2 = pnand %p683_p8, %p677_p6 }
  0x29   : > { %687 = shalt.err (!%p684_p2)
}
  0x2a   : > { %583 = dma.hbm_to_vmem [thread:$0]  (!%p928_p11), %s1113_s1, 64, %s149_s26, [#allocation7]  }
  0x2b   : > { %s688_s27 = scalar_lea.hbm %s1114_s2, 128 }
  0x2c   : > { %p689_p9 = scmp.ne.s32.totalorder %s1114_s2, %s688_s27  ;;  %p695_p2 = scmp.lt.u32.totalorder %s688_s27, %s1114_s2 }
  0x2e   : > { %p691_p1 = pnand %p689_p9, %p662_p13 }
  0x30   : > { %p692_p4 = pneg %p691_p1 }
  0x32   : > { %p697_p6 = pnand %p695_p2, %p692_p4 }
  0x34   : > { %700 = shalt.err (!%p697_p6)
}
  0x35   : > { %s701_s26 = scalar_lea.vmem %s932_s28, 128  ;;  %p709_p3 = scmp.lt.s32.totalorder %s932_s28, %s932_s28 }
  0x36   : > { %p702_p8 = scmp.ne.s32.totalorder %s932_s28, %s701_s26  ;;  %p710_p5 = scmp.lt.s32.totalorder %s701_s26, %s701_s26 }
  0x38   : > { %p704_p12 = pnand %p702_p8, %p662_p13  ;;  %p711_p7 = por %p710_p5, %p709_p3 }
  0x3a   : > { %p705_p0 = pneg %p704_p12 }
  0x3c   : > { %p712_p10 = pnand %p711_p7, %p705_p0 }
  0x3e   : > { %715 = shalt.err (!%p712_p10)
}
  0x3f   : > { %586 = dma.hbm_to_vmem [thread:$0]  (!%p928_p11), %s1114_s2, 128, %s932_s28, [#allocation7]  }
  0x40   : > { %s32_s9 = sadd.s32 1, %s828_s16  ;;  %s41_s10 = sadd.s32 1, %s820_s14 }
  0x41   : > { %p34_p13 = scmp.ge.s32.totalorder %s32_s9, 2  ;;  %p48_p9 = scmp.ne.s32.totalorder %s820_s14, %s816_s13 }
  0x42   : > { %p49_p1 = scmp.eq.s32.totalorder %s832_s17, 0  ;;  %p597_p4 = scmp.lt.s32.totalorder %s832_s17, 2 }
  0x43   : > { %s1140_s9 = smov (%p34_p13, %s32_s9), 0  ;;  %p1126_p6 = scmp.ne.s32.totalorder %s1121_s21, 0 }
  0x44   : > { %p50_p2 = por %p49_p1, %p48_p9  ;;  %s36_s11 = ssub.s32 %s828_s16, %s1140_s9 }
  0x45   : > { %p991_p8 = por %p1126_p6, %p48_p9  ;;  %s170_s18 = sand.u32 1, %s820_s14  }
  0x46   : > { %p39_p12 = scmp.eq.s32.totalorder %s36_s11, 0  ;;  %s529_s28 = sshll.u32 %s170_s18, 2 }
  0x47   : > { %s530_s19 = sshll.u32 %s828_s16, 6  ;;  %s174_s21 = scalar_lea.vmem [#allocation3], %s529_s28 }
  0x48   : > { %s1000_s25 = scalar_select %p39_p12, %s820_s14, %s41_s10  }
  0x49   : > { %s1005_s4 = scalar_lea.hbm %s1112_s0, %s530_s19  ;;  %s182_s5 = sshll.u32 %s174_s21, 4  ;;  %s1013_s5 = int_to_ptr.vmem [resolvable:$true] %s182_s5 }
  0x4a   : > { %p1009_p11 = pnand %p597_p4, %p50_p2  ;;  %s171_s26 = scalar_lea.sflag [#allocation4], %s170_s18 }
  0x4b   : > { %s716_s7 = scalar_lea.hbm %s1005_s4, 64  ;;  %s721_s11 = scalar_lea.hbm %s1112_s0, 128 }
  0x4c   : > { %p717_p0 = scmp.ne.s32.totalorder %s1005_s4, %s716_s7  ;;  %p718_p3 = pneg %p1009_p11 }
  0x4d   : > { %p722_p10 = scmp.lt.u32.totalorder %s1005_s4, %s1112_s0  ;;  %p723_p13 = scmp.lt.u32.totalorder %s721_s11, %s716_s7 }
  0x4e   : > { %p719_p5 = pnand %p718_p3, %p717_p0  ;;  %p725_p1 = scmp.lt.u32.totalorder %s716_s7, %s1005_s4 }
  0x4f   : > { %p724_p9 = por %p723_p13, %p722_p10 }
  0x50   : > { %p720_p7 = pneg %p719_p5 }
  0x51   : > { %p726_p4 = por %p725_p1, %p724_p9 }
  0x53   : > { %p727_p2 = pnand %p726_p4, %p720_p7 }
  0x55   : > { %730 = shalt.err (!%p727_p2)
}
  0x56   : > { %s731_s18 = scalar_lea.vmem %s1013_s5, 64  ;;  %s836_s27 = smov [#allocation3]  }
  0x57   : > { %p732_p6 = scmp.ne.s32.totalorder %s1013_s5, %s731_s18  ;;  %s736_s30 = sshll.u32 %s836_s27, 4  ;;  %s737_s30 = int_to_ptr.vmem [resolvable:$false] %s736_s30 }
  0x58   : > { %s738_s21 = scalar_lea.vmem %s737_s30, 128  ;;  %p739_p5 = scmp.lt.s32.totalorder %s1013_s5, %s737_s30 }
  0x59   : > { %p734_p12 = pnand %p732_p6, %p718_p3  ;;  %p740_p10 = scmp.lt.s32.totalorder %s738_s21, %s731_s18 }
  0x5b   : > { %p735_p0 = pneg %p734_p12  ;;  %p741_p13 = por %p740_p10, %p739_p5 }
  0x5d   : > { %p742_p9 = pnand %p741_p13, %p735_p0 }
  0x5f   : > { %745 = shalt.err (!%p742_p9)
}
  0x60   : > { %590 = dma.hbm_to_vmem [thread:$0]  (!%p1009_p11), %s1005_s4, 64, %s1013_s5, %s171_s26  }
  0x61   : > { %p1129_p7 = scmp.ne.s32.totalorder %s1124_s24, 0 }
  0x62   : > { %s1043_s7 = sand.u32 (!%p1129_p7), 1, %s816_s13   ;;  %p1130_p3 = scmp.ne.s32.totalorder (!%p1129_p7), %s1122_s22, 0 }
  0x63   : > { %191 = sbr.rel (%p1129_p7) target bundleno = 481 (0x1e1), region = 32  ;;  %s532_s8 = sshll.u32 (!%p1129_p7), %s1043_s7, 2 }
  0x64   : > { %s194_s10 = scalar_lea.sflag (!%p1129_p7), [#allocation4], %s1043_s7  ;;  %s197_s11 = scalar_lea.vmem (!%p1129_p7), [#allocation3], %s532_s8 }
  0x6a   : > { %799 = dma.done.wait (%p1130_p3), %s194_s10, 64  }
  0x6b   : > { %801 = vsyncadd (%p1130_p3), %s194_s10, 4294967232  ;;  %p1131_p1 = scmp.ne.s32.totalorder %s1120_s20, 0 }
  0x6d   : > { %803 = dma.done.wait (%p1131_p1), [#allocation7], 192  }
  0x6e   : > { %805 = vsyncadd (%p1131_p1), [#allocation7], 4294967104  ;;  %v837_v0 = vmov 0   ;;  %v838_v1 = vmov 0.0   ;;  %vm839_vm0 = vmmov 0   ;;  %s840_s22 = smov 2  }
  0x6f   : > { %235 = vst [vmem:[#allocation2] sm:$0x3] %v837_v0  ;;  %550 = vmatprep.subr.bf16.mxu0 %v838_v1  ;;  %556 = vmatprep.subr.bf16.mxu1 %v838_v1  ;;  %v229_v2 = vld [vmem:[%s197_s11] sm:$0xf]  ;;  %v238_v3 = vld [vmem:[#allocation6] sm:$0x7] }
  0x70   : > { %658 = vset.pattern.permute.xlu0 %v837_v0  ;;  %552 = vmatprep.mubr.msk.bf16.mxu0 %vm839_vm0, %v838_v1  ;;  %v230_v5 = vpack.c.bf16 %v229_v2, %v229_v2  ;;  %v536_v6 = vcombine.low %v238_v3, %v238_v3  ;;  %s841_s20 = smov 124   ;;  %s842_s24 = smov 4   ;;  %v401_v7 = vld [vmem:[#allocation8] sm:$0x3f]  ;;  %vm250_vm1 = vcmask 15360   ;;  %vm256_vm2 = vcmask 1041408  }
  0x71   : > { %558 = vmatprep.mubr.msk.bf16.mxu1 %vm839_vm0, %v838_v1  ;;  %s843_s4 = smov 120   ;;  %vm252_vm3 = vcmask 31744   ;;  %s535_s5 = sshll.u32 %s1043_s7, 3 }
  0x72   : > { %242 = vrot.lane.b32.xlu1 %v536_v6, %s841_s20  ;;  %v358_v15 = vsel %vm256_vm2, %v230_v5, 0  ;;  %s541_s6 = sshll.u32 %s824_s15, 7  ;;  %s227_s26 = scalar_lea.vmem [#allocation9], %s535_s5 }
  0x73   : > { %s424_s28 = sshll.u32 %s227_s26, 4  ;;  %s1063_s27 = scalar_lea.hbm %s1115_s3, %s541_s6  ;;  %s1065_s28 = int_to_ptr.vmem [resolvable:$true] %s424_s28 }
  0x74   : > { %s410_s30 = scalar_lea.sflag [#allocation5], %s1043_s7  ;;  %s746_s15 = scalar_lea.vmem %s1065_s28, 128 }
  0x75   : > { %p747_p11 = scmp.ne.s32.totalorder %s1065_s28, %s746_s15  ;;  %s844_s21 = smov [#allocation9]  }
  0x76   : > { %v236_v4 = vld [vmem:[#allocation2] sm:$0x3]  ;;  %s750_s8 = sshll.u32 %s844_s21, 4  ;;  %s751_s8 = int_to_ptr.vmem [resolvable:$false] %s750_s8 }
  0x77   : > { %246 = vrot.lane.b32.xlu0 %v236_v4, %s840_s22  ;;  %237 = vst [vmem:[#allocation2] sm:$0x3] %v230_v5  ;;  %300 = vrot.lane.b32.xlu1 %v236_v4, %s842_s24  ;;  %p748_p4 = pnand %p747_p11, %p991_p8  ;;  %s752_s10 = scalar_lea.vmem %s751_s8, 256 }
  0x78   : > { %p753_p6 = scmp.lt.s32.totalorder %s1065_s28, %s751_s8  ;;  %p754_p12 = scmp.lt.s32.totalorder %s752_s10, %s746_s15 }
  0x79   : > { %p749_p2 = pneg %p748_p4 }
  0x7a   : > { %p755_p0 = por %p754_p12, %p753_p6 }
  0x7b   : > { %248 = vrot.lane.b32.xlu0 %v230_v5, %s840_s22  ;;  %352 = vrot.lane.b32.xlu1 %v536_v6, %s843_s4 }
  0x7c   : > { %p756_p5 = pnand %p755_p0, %p749_p2 }
  0x7f   : > { %302 = vrot.lane.b32.xlu0 %v230_v5, %s842_s24 }
  0x83   : > { %404 = vperm.xlu0 %658, %v401_v7  }
  0xe4   : > { %v243_v9 = vpop.permute.xlu1 %242 }
  0xe9   : > { %v247_v8 = vpop.permute.xlu0 %246  ;;  %v301_v13 = vpop.permute.xlu1 %300 }
  0xed   : > { %v249_v10 = vpop.permute.xlu0 %248  ;;  %v353_v18 = vpop.permute.xlu1 %352 }
  0xee   : > { %v251_v11 = vsel %vm250_vm1, %v247_v8, %v249_v10 }
  0xef   : > { %v258_v12 = vsel %vm256_vm2, %v251_v11, 0 }
  0xf0   : > { %551 = vmatpush3.bf16.msra.mxu0 %v258_v12 }
  0xf1   : > { %v303_v14 = vpop.permute.xlu0 %302  ;;  %562 = vmatprep.subr.bf16.mxu0 %v838_v1 }
  0xf2   : > { %v305_v16 = vsel %vm252_vm3, %v301_v13, %v303_v14 }
  0xf3   : > { %553 = vmatmul.mubr.msk.bf16.vlgmr.msra.gmra.mrb[0].mxu0 %vm252_vm3, %v243_v9  ;;  %v310_v17 = vsel %vm256_vm2, %v305_v16, 0 }
  0xf4   : > { %557 = vmatpush3.bf16.msra.mxu1 %v310_v17  ;;  %563 = vmatpush3.bf16.msra.mxu0 %v358_v15 }
  0xf5   : > { %564 = vmatprep.mubr.msk.bf16.mxu0 %vm839_vm0, %v838_v1 }
  0xf7   : > { %559 = vmatmul.mubr.msk.bf16.vlgmr.msra.gmra.mrb[0].mxu1 %vm252_vm3, %v238_v3 }
  0xfb   : > { %565 = vmatmul.mubr.msk.bf16.vlgmr.msra.gmra.mrb[4].mxu0 %vm252_vm3, %v353_v18 }
 0x102   : > { %v405_v29 = vpop.permute.xlu0 %404 }
 0x1c6   : > { %v294_v19 = vpop.f32.mrb[0].mxu0 }
 0x1c7   : > { %v554_v20 = vpop.f32.mrb[1].mxu0 }
 0x1c8   : > { %v297_v21 = vpop.f32.mrb[2].mxu0 }
 0x1c9   : > { %v555_v22 = vpop.f32.mrb[3].mxu0 }
 0x1ca   : > { %v346_v23 = vpop.f32.mrb[0].mxu1 }
 0x1cb   : > { %v347_v24 = vadd.f32 %v346_v23, %v294_v19  ;;  %v560_v25 = vpop.f32.mrb[1].mxu1 }
 0x1cc   : > { %v349_v26 = vpop.f32.mrb[2].mxu1 }
 0x1cd   : > { %v561_v27 = vpop.f32.mrb[3].mxu1 }
 0x1ce   : > { %v394_v28 = vpop.f32.mrb[4].mxu0 }
 0x1cf   : > { %v400_v30 = vadd.f32 %v394_v28, %v347_v24  ;;  %v566_v31 = vpop.f32.mrb[5].mxu0 }
 0x1d0   : > { %v397_v32 = vpop.f32.mrb[6].mxu0 }
 0x1d1   : > { %v407_v33 = vadd.f32 %v405_v29, %v400_v30  ;;  %v567_v34 = vpop.f32.mrb[7].mxu0 }
 0x1d3   : > { %408 = vst [vmem:[%s227_s26] sm:$0x3f] %v407_v33 }
 0x1d4   : > { %759 = shalt.err (!%p756_p5)
}
 0x1d5   : > { %s760_s7 = scalar_lea.hbm %s1063_s27, 128  ;;  %s764_s20 = scalar_lea.hbm %s1115_s3, 256 }
 0x1d6   : > { %p761_p10 = scmp.ne.s32.totalorder %s1063_s27, %s760_s7  ;;  %p765_p7 = scmp.lt.u32.totalorder %s1063_s27, %s1115_s3 }
 0x1d7   : > { %p766_p3 = scmp.lt.u32.totalorder %s764_s20, %s760_s7  ;;  %p768_p11 = scmp.lt.u32.totalorder %s760_s7, %s1063_s27 }
 0x1d8   : > { %p762_p13 = pnand %p761_p10, %p991_p8 }
 0x1d9   : > { %p767_p1 = por %p766_p3, %p765_p7 }
 0x1da   : > { %p763_p9 = pneg %p762_p13 }
 0x1db   : > { %p769_p4 = por %p768_p11, %p767_p1 }
 0x1dd   : > { %p770_p2 = pnand %p769_p4, %p763_p9 }
 0x1df   : > { %773 = shalt.err (!%p770_p2)
}
 0x1e0   : > { %578 = dma.vmem_to_hbm [thread:$0]  (%p991_p8), %s1065_s28, 128, %s1063_s27, %s410_s30  }
 0x1e1 PF: > { %s436_s5 = sand.u32 1, %s812_s12   ;;  %p1132_p6 = scmp.ne.s32.totalorder %s1123_s23, 0 }
 0x1e2   : > { %p1133_p12 = scmp.ge.s32.totalorder %s832_s17, 2  ;;  %s437_s6 = scalar_lea.sflag [#allocation5], %s436_s5 }
 0x1e4   : > { %p592_p0 = pnand %p1133_p12, %p1132_p6 }
 0x1e6   : > { %807 = dma.done.wait (!%p592_p0), %s437_s6, 128  }
 0x1e7   : > { %809 = vsyncadd (!%p592_p0), %s437_s6, 4294967168  ;;  %s20_s17 = sadd.s32 1, %s832_s17   ;;  %s1134_s12 = smov %s816_s13 }
 0x1e8   : > { %p17_p5 = scmp.ge.s32.totalorder %s20_s17, 4   ;;  %s1135_s13 = smov %s820_s14 }
 0x1e9   : > { %s1136_s14 = smov %s1000_s25  ;;  %s1137_s15 = smov %s828_s16 }
 0x1ea   : > { %s1138_s16 = smov %s1140_s9  ;;  %19 = sbr.rel (!%p17_p5) target bundleno = 7 (0x7), region = 89 }
 0x1f1   :  { %442 = vsyncpa [#allocation4], 1 }
 0x1f2   :  { %444 = vsyncpa [#allocation4 + $0x1], 1 }
 0x1f3   :  { %445 = vsyncpa [#allocation7], 1 }
 0x1f4   :  { %446 = vsyncpa [#allocation5], 1 }
 0x1f5   :  { %448 = vsyncpa [#allocation5 + $0x1], 1 }

</bundles_post_ra>
